<compile_context>
chip_gen: v7x
topology: tpu7x:2x2x1
jax: 0.10.0
libtpu: 0.0.40
codegen_flags: <defaults>
</compile_context>

<pallas_src>
import jax
import jax.numpy as jnp
from jax.experimental import pallas as pl
from jax.experimental.pallas import tpu as pltpu


def _copy_kernel(x_ref, o_ref):
    # Lane-dense identity copy of one (TB, TD) tile.
    o_ref[...] = x_ref[...]


def _vmem_scoped_limit_bytes() -> int:
    """Generation-aware scoped-VMEM limit, made explicit (not the release default)."""
    try:
        cap = int(pltpu.get_tpu_info().vmem_capacity_bytes)
    except Exception:
        cap = 64 << 20  # conservative fallback: v7x per-TC physical VMEM
    # Half of physical, capped at 64 MiB: v5e/v6e (128 MiB) -> 64 MiB scoped,
    # v7x (64 MiB) -> 32 MiB scoped.
    return min(cap // 2, 64 << 20)


def _pick_tiles(B: int, D: int, itemsize: int, block_bytes_max: int):
    """Pick (TB, TD) so 4 * TB * TD * itemsize (double-buffered in+out) fits."""
    sub = max(8, 32 // itemsize)  # sublane-packing multiple: 8 f32 / 16 bf16 / 32 i8
    lane = 128

    row_bytes = D * itemsize
    if sub * row_bytes <= block_bytes_max:
        # Full feature width fits in one block; tile only the batch axis,
        # bounded by bytes (not a fixed row cap).
        TD = D
        max_rows = block_bytes_max // row_bytes
        max_rows = max(sub, (max_rows // sub) * sub)
        TB = B if B <= max_rows else max_rows
    else:
        # Very large H*F: tile the feature axis in 128-lane multiples so even
        # the minimum-height block stays inside the VMEM budget.
        TB = B if B <= sub else sub
        max_cols = block_bytes_max // max(1, TB * itemsize)
        TD = max(lane, (max_cols // lane) * lane)
        TD = min(TD, D)

    # If the copy collapses to a single grid step but is large, split the
    # feature axis so both v7x TensorCores (both DMA paths) get work.
    if (pl.cdiv(B, TB) * pl.cdiv(D, TD) == 1
            and B * D * itemsize >= (4 << 20)
            and D % 256 == 0):
        TD = D // 2
    return TB, TD


def temporal_concat_pooling(x: jnp.ndarray, mask: jnp.ndarray = None,
                            *, use_kernel: bool = False) -> jnp.ndarray:
    """x: (B, H, F) -> (B, H*F); identical to torch's x.view(B, -1).

    Default: the flatten is a free row-major metadata reshape, so no kernel is
    launched (the review's highest-value change). Set use_kernel=True to route
    the data movement through an aliased, tiled Pallas identity-copy kernel.
    """
    del mask  # unused, matching the PyTorch module
    B, H, F = x.shape
    D = H * F

    # Free, row-major flatten (no data movement) -- this IS the whole op.
    x2d = x.reshape(B, D)
    if not use_kernel:
        return x2d

    itemsize = jnp.dtype(x.dtype).itemsize
    vmem_limit = _vmem_scoped_limit_bytes()
    # Headroom: use 3/4 of the scoped limit; 4 live blocks (double-buffered
    # input + output) share it.
    block_bytes_max = max(itemsize * 8 * 128, (vmem_limit * 3 // 4) // 4)
    TB, TD = _pick_tiles(B, D, itemsize, block_bytes_max)

    grid = (pl.cdiv(B, TB), pl.cdiv(D, TD))

    return pl.pallas_call(
        _copy_kernel,
        out_shape=jax.ShapeDtypeStruct((B, D), x.dtype),
        grid=grid,
        in_specs=[pl.BlockSpec((TB, TD), lambda i, j: (i, j))],
        out_specs=pl.BlockSpec((TB, TD), lambda i, j: (i, j)),
        # Reuse the input HBM buffer for the output: no second (B, D) buffer,
        # and XLA may elide the copy entirely.
        input_output_aliases={0: 0},
        # Pure-DMA op: tell the scheduler there is no compute to hide.
        cost_estimate=pl.CostEstimate(
            flops=0, transcendentals=0, bytes_accessed=2 * B * D * itemsize),
        compiler_params=pltpu.CompilerParams(
            # Both axes are independent: shard across TensorCores on v7x.
            dimension_semantics=("parallel", "parallel"),
            vmem_limit_bytes=vmem_limit,
        ),
    )(x2d)


if __name__ == "__main__":
    # Shapes consistent with the module's forward:
    # batch=2, history_len=8, feature_size=32 -> out_features = 8*32 = 256.
    B, H, F = 2, 8, 32
    key = jax.random.PRNGKey(0)
    x = jax.random.normal(key, (B, H, F), dtype=jnp.float32)

    ref = x.reshape(B, H * F)

    # Recommended path: free reshape, no kernel launched.
    out_free = jax.block_until_ready(temporal_concat_pooling(x))

    # Kernel path (jitted so the aliased intermediate buffer is freely reused):
    kernel_fn = jax.jit(lambda t: temporal_concat_pooling(t, use_kernel=True))
    out_kernel = jax.block_until_ready(kernel_fn(x))

    for out in (out_free, out_kernel):
        assert out.shape == (B, H * F), out.shape
        assert out.dtype == x.dtype
        assert jnp.array_equal(out, ref), "mismatch vs reference reshape"

    print("KERNEL_OK")
</pallas_src>

<mosaic_0001>
module attributes {stable_mosaic.version = 11 : i64} {
  func.func @_copy_kernel(%arg0: i32, %arg1: i32, %arg2: memref<2x256xf32, #tpu.memory_space<vmem>>, %arg3: memref<2x256xf32, #tpu.memory_space<vmem>>) attributes {dimension_semantics = [#tpu.dimension_semantics<parallel>, #tpu.dimension_semantics<parallel>], iteration_bounds = array<i64: 1, 1>, scalar_prefetch = 0 : i64, scratch_operands = 0 : i64, tpu.core_type = #tpu.core_type<tc>, window_params = [{transform_indices = @transform_0, window_bounds = array<i64: 2, 256>}, {transform_indices = @transform_1, window_bounds = array<i64: 2, 256>}]} {
    %c0 = arith.constant 0 : index
    %c0_0 = arith.constant 0 : index
    %0 = vector.load %arg2[%c0, %c0_0] : memref<2x256xf32, #tpu.memory_space<vmem>>, vector<2x256xf32>
    %c0_1 = arith.constant 0 : index
    %c0_2 = arith.constant 0 : index
    %1 = vector.load %arg3[%c0_1, %c0_2] : memref<2x256xf32, #tpu.memory_space<vmem>>, vector<2x256xf32>
    tpu.vector_store %arg3[%c0_1, %c0_2], %0 {strides = array<i32>} : memref<2x256xf32, #tpu.memory_space<vmem>>, vector<2x256xf32>,
    return
  }
  func.func @transform_0(%arg0: i32, %arg1: i32) -> (i32, i32) {
    %c0_i32 = arith.constant 0 : i32
    return %arg0, %arg1 : i32, i32
  }
  func.func @transform_1(%arg0: i32, %arg1: i32) -> (i32, i32) {
    %c0_i32 = arith.constant 0 : i32
    return %arg0, %arg1 : i32, i32
  }
}

</mosaic_0001>

<bundles_post_ra>
// kernel: _lambda_.1
= control target key start
LH: loop header
LB: loop body
LE: loop exit
PB: predicated region body
PF: predicated region fallthrough
CT: control target
= control target key end

     0   :  { %6 = vsyncpa [#allocation3], 0  ;;  %s124_s0 = inlined_call_operand.hbm [shape: f32[2,256], index: 0, kind: input, shape index: {}, may-alias: {0,1}]   ;;  %s125_s1 = inlined_call_operand.hbm [shape: f32[2,256], index: 1, kind: output, shape index: {}, may-alias: {0,1}]  }
   0x1   :  { %7 = vsyncpa [#allocation4], 0  ;;  %s88_s6 = smov [#allocation2]   ;;  %s40_s10 = scalar_lea.hbm %s124_s0, 64 }
   0x2   :  { %s14_s7 = sshll.u32 %s88_s6, 4  ;;  %p41_p0 = scmp.ne.s32.totalorder %s124_s0, %s40_s10  ;;  %s15_s7 = int_to_ptr.vmem [resolvable:$true] %s14_s7 }
   0x3   :  { %p44_p1 = scmp.lt.u32.totalorder %s40_s10, %s124_s0 }
   0x5   :  { %p46_p2 = pnand %p44_p1, %p41_p0 }
   0x7   :  { %49 = shalt.err (!%p46_p2)
}
   0x8   :  { %s50_s15 = scalar_lea.vmem %s15_s7, 64  ;;  %p55_p4 = scmp.lt.s32.totalorder %s15_s7, %s15_s7 }
   0x9   :  { %p51_p3 = scmp.ne.s32.totalorder %s15_s7, %s50_s15  ;;  %p56_p5 = scmp.lt.s32.totalorder %s50_s15, %s50_s15 }
   0xb   :  { %p57_p6 = por %p56_p5, %p55_p4 }
   0xd   :  { %p58_p7 = pnand %p57_p6, %p51_p3 }
   0xf   :  { %61 = shalt.err (!%p58_p7)
}
  0x10   :  { %17 = dma.hbm_to_vmem [thread:$0]  %s124_s0, 64, %s15_s7, [#allocation3]  }
  0x11   :  { %84 = dma.done.wait [#allocation3], 64  }
  0x12   :  { %85 = vsyncadd [#allocation3], 4294967232  ;;  %s89_s18 = smov [#allocation5]   ;;  %v21_v0 = vld [vmem:[#allocation2] sm:$0xf] }
  0x13   :  { %s29_s19 = sshll.u32 %s89_s18, 4  ;;  %22 = vst [vmem:[#allocation5] sm:$0xf] %v21_v0  ;;  %s30_s19 = int_to_ptr.vmem [resolvable:$true] %s29_s19 }
  0x14   :  { %s62_s20 = scalar_lea.vmem %s30_s19, 64  ;;  %p67_p9 = scmp.lt.s32.totalorder %s30_s19, %s30_s19 }
  0x15   :  { %p63_p8 = scmp.ne.s32.totalorder %s30_s19, %s62_s20  ;;  %p68_p10 = scmp.lt.s32.totalorder %s62_s20, %s62_s20 }
  0x17   :  { %p69_p11 = por %p68_p10, %p67_p9 }
  0x19   :  { %p70_p12 = pnand %p69_p11, %p63_p8 }
  0x1b   :  { %73 = shalt.err (!%p70_p12)
}
  0x1c   :  { %s74_s23 = scalar_lea.hbm %s125_s1, 64 }
  0x1d   :  { %p75_p13 = scmp.ne.s32.totalorder %s125_s1, %s74_s23  ;;  %p78_p0 = scmp.lt.u32.totalorder %s74_s23, %s125_s1 }
  0x1f   :  { %p80_p1 = pnand %p78_p0, %p75_p13 }
  0x21   :  { %83 = shalt.err (!%p80_p1)
}
  0x22   :  { %32 = dma.vmem_to_hbm [thread:$0]  %s30_s19, 64, %s125_s1, [#allocation4]  }
  0x23   :  { %86 = dma.done.wait [#allocation4], 64  }
  0x24   :  { %87 = vsyncadd [#allocation4], 4294967232 }
  0x25   :  { %36 = vsyncpa [#allocation3], 1 }
  0x26   :  { %37 = vsyncpa [#allocation4], 1 }

</bundles_post_ra>
